<compile_context>
chip_gen: v5e
topology: v5e:2x2
jax: 0.10.0
libtpu: 0.0.40
codegen_flags: <defaults>
</compile_context>

<pallas_src>
import functools

import jax
import jax.numpy as jnp
from jax import lax
from jax.experimental import pallas as pl
from jax.experimental.pallas import tpu as pltpu


_NEG_LARGE = float(jnp.finfo(jnp.float32).min)   # finite "-inf" sentinel
_LANES = 128
_MAX_CLASS_TILE = 8192      # class-tile upper bound (multiple of 128)
_MAX_ROW_TILE = 512         # row-tile upper bound


def _round_up(v, m):
    return ((v + m - 1) // m) * m


def _round_down(v, m):
    return (v // m) * m


def _default_vmem_limit_bytes():
    """Generation-aware scoped-VMEM budget (~70% of physical VMEM)."""
    try:
        cap = pltpu.get_tpu_info().vmem_capacity_bytes
    except Exception:
        cap = 64 * 1024 * 1024            # v7x-sized conservative fallback
    return int(min(100 * 1024 * 1024, max(32 * 1024 * 1024, (cap * 7) // 10)))


def _label_smooth_loss_kernel(x_ref, t_ref, o_ref,
                              m_sc, l_sc, s_sc, xt_sc, *,
                              smoothing, n_rows, n_cols, tile_r, tile_c,
                              ragged_cols, ragged_rows):
    i = pl.program_id(0)                  # row-tile index   ("parallel")
    j = pl.program_id(1)                  # class-tile index ("arbitrary", innermost)
    nj = pl.num_programs(1)

    @pl.when(j == 0)
    def _init():
        m_sc[...] = jnp.full(m_sc.shape, _NEG_LARGE, dtype=jnp.float32)
        l_sc[...] = jnp.zeros(l_sc.shape, dtype=jnp.float32)
        s_sc[...] = jnp.zeros(s_sc.shape, dtype=jnp.float32)
        xt_sc[...] = jnp.zeros(xt_sc.shape, dtype=jnp.float32)

    # Load once, upcast per tile in-vreg (HBM traffic stays in native dtype).
    xf = x_ref[...].astype(jnp.float32)                      # (tile_r, tile_c)

    # Target hit: local column iota vs (target - tile base).  No col_valid
    # AND needed: targets are < n_cols, padded columns have local ids >= the
    # valid width, so equality can never hold on padded columns.
    t_loc = t_ref[...] - j * tile_c                          # (tile_r, 1) int32
    col_loc = lax.broadcasted_iota(jnp.int32, (tile_r, tile_c), 1)
    hit = col_loc == t_loc                                   # (tile_r, tile_c)

    def update(x_for_max, x_for_sum):
        # --- online logsumexp (running max + rescaled exp-sum) ---
        m_prev = m_sc[...]
        m_new = jnp.maximum(m_prev,
                            jnp.max(x_for_max, axis=-1, keepdims=True))
        alpha = jnp.exp(m_prev - m_new)
        l_sc[...] = alpha * l_sc[...] + jnp.sum(
            jnp.exp(x_for_max - m_new), axis=-1, keepdims=True)
        m_sc[...] = m_new
        # --- running sum of logits ---
        s_sc[...] = s_sc[...] + jnp.sum(x_for_sum, axis=-1, keepdims=True)
        # --- running x[target] (SELECT keeps padded garbage out) ---
        xt_sc[...] = xt_sc[...] + jnp.sum(
            jnp.where(hit, x_for_sum, 0.0), axis=-1, keepdims=True)

    if ragged_cols:
        # Hot path: every class tile except the last is full -> no masking.
        @pl.when(j < nj - 1)
        def _full_tile():
            update(xf, xf)

        # Only the last class tile can be ragged -> mask only there.
        @pl.when(j == nj - 1)
        def _ragged_tile():
            valid = col_loc < (n_cols - j * tile_c)
            update(jnp.where(valid, xf, _NEG_LARGE),
                   jnp.where(valid, xf, 0.0))
    else:
        update(xf, xf)

    @pl.when(j == nj - 1)
    def _finalize():
        lse = m_sc[...] + jnp.log(l_sc[...])                 # (tile_r, 1)
        off = float(smoothing) / float(max(n_cols - 1, 1))   # C==1 guard
        on = 1.0 - float(smoothing)
        loss = (off * (float(n_cols) * lse - s_sc[...])
                + (on - off) * (lse - xt_sc[...]))
        if ragged_rows:
            row_ids = i * tile_r + lax.broadcasted_iota(
                jnp.int32, (tile_r, 1), 0)
            loss = jnp.where(row_ids < n_rows, loss, 0.0)
        o_ref[...] = loss


def label_smooth_loss(x, target, smoothing=0.1, *,
                      row_tile=_MAX_ROW_TILE, class_tile=_MAX_CLASS_TILE,
                      vmem_limit_bytes=None):
    """x: (N, C) float (any dtype), target: (N,) int -> scalar float32 loss."""
    n, c = x.shape
    t2d = target.astype(jnp.int32).reshape(n, 1)
    itemsize = jnp.dtype(x.dtype).itemsize

    if vmem_limit_bytes is None:
        vmem_limit_bytes = _default_vmem_limit_bytes()

    # Sublane packing granularity of the logits dtype.
    sub = {4: 8, 2: 16, 1: 32}.get(itemsize, 8)

    # ---- Row tile: multiple of `sub` (or full N).  Keep >= 2 row tiles when
    # N allows so the "parallel" row axis splits across both v7x TensorCores.
    row_cap = max(sub, _round_down(row_tile, sub))
    if n <= sub:
        tr = n
    else:
        tr = min(row_cap, _round_up(pl.cdiv(n, 2), sub))
    num_ri = pl.cdiv(n, tr)

    # ---- Class tile: full extent when it fits the VMEM budget, else the
    # largest multiple of 128 such that the f32 working set (double-buffered
    # input + elementwise temporaries, ~7x the tile) stays under the limit.
    tile_budget = max(_LANES * tr * 4, vmem_limit_bytes // 7)
    tc_cap = _round_down(tile_budget // (tr * 4), _LANES)
    tc_cap = max(_LANES,
                 min(tc_cap, _round_down(max(class_tile, _LANES), _LANES)))
    tc = c if c <= tc_cap else tc_cap
    num_cj = pl.cdiv(c, tc)

    ragged_cols = (tc < c) and (c % tc != 0)
    ragged_rows = (n % tr) != 0

    kernel = functools.partial(
        _label_smooth_loss_kernel,
        smoothing=float(smoothing), n_rows=n, n_cols=c,
        tile_r=tr, tile_c=tc,
        ragged_cols=ragged_cols, ragged_rows=ragged_rows)

    cost = pl.CostEstimate(
        flops=8 * n * c,
        transcendentals=n * c,
        bytes_accessed=n * c * itemsize + n * 4 + num_ri * tr * 4)

    partial_rows = pl.pallas_call(
        kernel,
        out_shape=jax.ShapeDtypeStruct((num_ri * tr, 1), jnp.float32),
        grid_spec=pltpu.PrefetchScalarGridSpec(
            num_scalar_prefetch=0,
            grid=(num_ri, num_cj),
            in_specs=[
                pl.BlockSpec((tr, tc), lambda i, j: (i, j)),   # logits tile
                pl.BlockSpec((tr, 1), lambda i, j: (i, 0)),    # targets column
            ],
            out_specs=pl.BlockSpec((tr, 1), lambda i, j: (i, 0)),
            scratch_shapes=[pltpu.VMEM((tr, 1), jnp.float32)] * 4,
        ),
        compiler_params=pltpu.CompilerParams(
            dimension_semantics=("parallel", "arbitrary"),
            vmem_limit_bytes=int(vmem_limit_bytes),
        ),
        cost_estimate=cost,
    )(x, t2d)

    # Final mean over the TRUE batch size (padded rows were masked to 0).
    return jnp.sum(partial_rows) / jnp.float32(n)


def _reference(x, target, smoothing=0.1):
    x = x.astype(jnp.float32)
    n, c = x.shape
    log_prob = jax.nn.log_softmax(x, axis=-1)
    weight = jnp.full((n, c), smoothing / (c - 1.0), dtype=jnp.float32)
    weight = weight.at[jnp.arange(n), target].set(1.0 - smoothing)
    return jnp.mean(jnp.sum(-weight * log_prob, axis=-1))


if __name__ == "__main__":
    # Primary small test (shapes consistent with the module: logits x classes).
    key = jax.random.PRNGKey(0)
    kx, kt = jax.random.split(key)
    N, C = 8, 32
    x = jax.random.normal(kx, (N, C), dtype=jnp.float32)
    target = jax.random.randint(kt, (N,), 0, C, dtype=jnp.int32)
    loss = jax.block_until_ready(label_smooth_loss(x, target, smoothing=0.1))
    ref = jax.block_until_ready(_reference(x, target, smoothing=0.1))
    assert jnp.allclose(loss, ref, rtol=1e-5, atol=1e-5), (loss, ref)

    # Ragged row tiles (2 row tiles -> megacore path) + single class tile.
    kx2, kt2 = jax.random.split(jax.random.PRNGKey(1))
    N2, C2 = 300, 2500
    x2 = jax.random.normal(kx2, (N2, C2), dtype=jnp.float32)
    target2 = jax.random.randint(kt2, (N2,), 0, C2, dtype=jnp.int32)
    loss2 = jax.block_until_ready(label_smooth_loss(x2, target2, smoothing=0.1))
    ref2 = jax.block_until_ready(_reference(x2, target2, smoothing=0.1))
    assert jnp.allclose(loss2, ref2, rtol=1e-4, atol=1e-4), (loss2, ref2)

    # Class tiling with a ragged last class tile + bf16 streaming
    # (class_tile=256 forces the tiled/masked path on a small problem).
    kx3, kt3 = jax.random.split(jax.random.PRNGKey(2))
    N3, C3 = 64, 1000
    x3 = jax.random.normal(kx3, (N3, C3), dtype=jnp.float32).astype(jnp.bfloat16)
    target3 = jax.random.randint(kt3, (N3,), 0, C3, dtype=jnp.int32)
    loss3 = jax.block_until_ready(
        label_smooth_loss(x3, target3, smoothing=0.1, class_tile=256))
    ref3 = jax.block_until_ready(_reference(x3, target3, smoothing=0.1))
    assert jnp.allclose(loss3, ref3, rtol=2e-3, atol=2e-3), (loss3, ref3)

    print("KERNEL_OK")
</pallas_src>

<mosaic_0001>
module attributes {stable_mosaic.version = 11 : i64} {
  func.func @_label_smooth_loss_kernel(%arg0: i32, %arg1: i32, %arg2: memref<8x32xf32, #tpu.memory_space<vmem>>, %arg3: memref<8x1xi32, #tpu.memory_space<vmem>>, %arg4: memref<8x1xf32, #tpu.memory_space<vmem>>, %arg5: memref<8x1xf32, #tpu.memory_space<vmem>>, %arg6: memref<8x1xf32, #tpu.memory_space<vmem>>, %arg7: memref<8x1xf32, #tpu.memory_space<vmem>>, %arg8: memref<8x1xf32, #tpu.memory_space<vmem>>) attributes {dimension_semantics = [#tpu.dimension_semantics<parallel>, #tpu.dimension_semantics<arbitrary>], iteration_bounds = array<i64: 1, 1>, scalar_prefetch = 0 : i64, scratch_operands = 4 : i64, tpu.core_type = #tpu.core_type<tc>, window_params = [{transform_indices = @transform_0, window_bounds = array<i64: 8, 32>}, {transform_indices = @transform_1, window_bounds = array<i64: 8, 1>}, {transform_indices = @transform_2, window_bounds = array<i64: 8, 1>}]} {
    %c0_i32 = arith.constant 0 : i32
    %0 = arith.cmpi eq, %arg1, %c0_i32 : i32
    %1 = arith.extui %0 : i1 to i32
    %c0_i32_0 = arith.constant 0 : i32
    %2 = arith.cmpi ne, %1, %c0_i32_0 : i32
    scf.if %2 {
      %cst_26 = arith.constant -3.40282347E+38 : f32
      %42 = vector.broadcast %cst_26 : f32 to vector<8x1xf32>
      %c0_27 = arith.constant 0 : index
      %c0_28 = arith.constant 0 : index
      %43 = vector.load %arg5[%c0_27, %c0_28] : memref<8x1xf32, #tpu.memory_space<vmem>>, vector<8x1xf32>
      tpu.vector_store %arg5[%c0_27, %c0_28], %42 {strides = array<i32>} : memref<8x1xf32, #tpu.memory_space<vmem>>, vector<8x1xf32>,
      %cst_29 = arith.constant 0.000000e+00 : f32
      %44 = vector.broadcast %cst_29 : f32 to vector<8x1xf32>
      %c0_30 = arith.constant 0 : index
      %c0_31 = arith.constant 0 : index
      %45 = vector.load %arg6[%c0_30, %c0_31] : memref<8x1xf32, #tpu.memory_space<vmem>>, vector<8x1xf32>
      tpu.vector_store %arg6[%c0_30, %c0_31], %44 {strides = array<i32>} : memref<8x1xf32, #tpu.memory_space<vmem>>, vector<8x1xf32>,
      %cst_32 = arith.constant 0.000000e+00 : f32
      %46 = vector.broadcast %cst_32 : f32 to vector<8x1xf32>
      %c0_33 = arith.constant 0 : index
      %c0_34 = arith.constant 0 : index
      %47 = vector.load %arg7[%c0_33, %c0_34] : memref<8x1xf32, #tpu.memory_space<vmem>>, vector<8x1xf32>
      tpu.vector_store %arg7[%c0_33, %c0_34], %46 {strides = array<i32>} : memref<8x1xf32, #tpu.memory_space<vmem>>, vector<8x1xf32>,
      %cst_35 = arith.constant 0.000000e+00 : f32
      %48 = vector.broadcast %cst_35 : f32 to vector<8x1xf32>
      %c0_36 = arith.constant 0 : index
      %c0_37 = arith.constant 0 : index
      %49 = vector.load %arg8[%c0_36, %c0_37] : memref<8x1xf32, #tpu.memory_space<vmem>>, vector<8x1xf32>
      tpu.vector_store %arg8[%c0_36, %c0_37], %48 {strides = array<i32>} : memref<8x1xf32, #tpu.memory_space<vmem>>, vector<8x1xf32>,
    } else {
    }
    %c0 = arith.constant 0 : index
    %c0_1 = arith.constant 0 : index
    %3 = vector.load %arg2[%c0, %c0_1] : memref<8x32xf32, #tpu.memory_space<vmem>>, vector<8x32xf32>
    %c0_2 = arith.constant 0 : index
    %c0_3 = arith.constant 0 : index
    %4 = vector.load %arg3[%c0_2, %c0_3] : memref<8x1xi32, #tpu.memory_space<vmem>>, vector<8x1xi32>
    %c32_i32 = arith.constant 32 : i32
    %5 = arith.muli %arg1, %c32_i32 : i32
    %6 = vector.broadcast %5 : i32 to vector<8x1xi32>
    %7 = arith.subi %4, %6 : vector<8x1xi32>
    %8 = tpu.iota {dimensions = array<i32: 1>} : vector<8x32xi32>
    %9 = vector.broadcast %7 : vector<8x1xi32> to vector<8x32xi32>
    %10 = arith.cmpi eq, %8, %9 : vector<8x32xi32>
    %c0_4 = arith.constant 0 : index
    %c0_5 = arith.constant 0 : index
    %11 = vector.load %arg5[%c0_4, %c0_5] : memref<8x1xf32, #tpu.memory_space<vmem>>, vector<8x1xf32>
    %cst = arith.constant dense<0xFF800000> : vector<8xf32>
    %12 = vector.multi_reduction <maximumf>, %3, %cst [1] : vector<8x32xf32> to vector<8xf32>
    %13 = vector.shape_cast %12 : vector<8xf32> to vector<8x1xf32>
    %14 = arith.maximumf %11, %13 : vector<8x1xf32>
    %15 = arith.subf %11, %14 : vector<8x1xf32>
    %16 = math.exp %15 : vector<8x1xf32>
    %c0_6 = arith.constant 0 : index
    %c0_7 = arith.constant 0 : index
    %17 = vector.load %arg6[%c0_6, %c0_7] : memref<8x1xf32, #tpu.memory_space<vmem>>, vector<8x1xf32>
    %18 = arith.mulf %16, %17 : vector<8x1xf32>
    %19 = vector.broadcast %14 : vector<8x1xf32> to vector<8x32xf32>
    %20 = arith.subf %3, %19 : vector<8x32xf32>
    %21 = math.exp %20 : vector<8x32xf32>
    %cst_8 = arith.constant dense<0.000000e+00> : vector<8xf32>
    %22 = vector.multi_reduction <add>, %21, %cst_8 [1] : vector<8x32xf32> to vector<8xf32>
    %23 = vector.shape_cast %22 : vector<8xf32> to vector<8x1xf32>
    %24 = arith.addf %18, %23 : vector<8x1xf32>
    %c0_9 = arith.constant 0 : index
    %c0_10 = arith.constant 0 : index
    %25 = vector.load %arg6[%c0_9, %c0_10] : memref<8x1xf32, #tpu.memory_space<vmem>>, vector<8x1xf32>
    tpu.vector_store %arg6[%c0_9, %c0_10], %24 {strides = array<i32>} : memref<8x1xf32, #tpu.memory_space<vmem>>, vector<8x1xf32>,
    %c0_11 = arith.constant 0 : index
    %c0_12 = arith.constant 0 : index
    %26 = vector.load %arg5[%c0_11, %c0_12] : memref<8x1xf32, #tpu.memory_space<vmem>>, vector<8x1xf32>
    tpu.vector_store %arg5[%c0_11, %c0_12], %14 {strides = array<i32>} : memref<8x1xf32, #tpu.memory_space<vmem>>, vector<8x1xf32>,
    %c0_13 = arith.constant 0 : index
    %c0_14 = arith.constant 0 : index
    %27 = vector.load %arg7[%c0_13, %c0_14] : memref<8x1xf32, #tpu.memory_space<vmem>>, vector<8x1xf32>
    %cst_15 = arith.constant dense<0.000000e+00> : vector<8xf32>
    %28 = vector.multi_reduction <add>, %3, %cst_15 [1] : vector<8x32xf32> to vector<8xf32>
    %29 = vector.shape_cast %28 : vector<8xf32> to vector<8x1xf32>
    %30 = arith.addf %27, %29 : vector<8x1xf32>
    %c0_16 = arith.constant 0 : index
    %c0_17 = arith.constant 0 : index
    %31 = vector.load %arg7[%c0_16, %c0_17] : memref<8x1xf32, #tpu.memory_space<vmem>>, vector<8x1xf32>
    tpu.vector_store %arg7[%c0_16, %c0_17], %30 {strides = array<i32>} : memref<8x1xf32, #tpu.memory_space<vmem>>, vector<8x1xf32>,
    %c0_18 = arith.constant 0 : index
    %c0_19 = arith.constant 0 : index
    %32 = vector.load %arg8[%c0_18, %c0_19] : memref<8x1xf32, #tpu.memory_space<vmem>>, vector<8x1xf32>
    %cst_20 = arith.constant 0.000000e+00 : f32
    %33 = vector.broadcast %cst_20 : f32 to vector<8x32xf32>
    %34 = arith.select %10, %3, %33 : vector<8x32xi1>, vector<8x32xf32>
    %cst_21 = arith.constant dense<0.000000e+00> : vector<8xf32>
    %35 = vector.multi_reduction <add>, %34, %cst_21 [1] : vector<8x32xf32> to vector<8xf32>
    %36 = vector.shape_cast %35 : vector<8xf32> to vector<8x1xf32>
    %37 = arith.addf %32, %36 : vector<8x1xf32>
    %c0_22 = arith.constant 0 : index
    %c0_23 = arith.constant 0 : index
    %38 = vector.load %arg8[%c0_22, %c0_23] : memref<8x1xf32, #tpu.memory_space<vmem>>, vector<8x1xf32>
    tpu.vector_store %arg8[%c0_22, %c0_23], %37 {strides = array<i32>} : memref<8x1xf32, #tpu.memory_space<vmem>>, vector<8x1xf32>,
    %c0_i32_24 = arith.constant 0 : i32
    %39 = arith.cmpi eq, %arg1, %c0_i32_24 : i32
    %40 = arith.extui %39 : i1 to i32
    %c0_i32_25 = arith.constant 0 : i32
    %41 = arith.cmpi ne, %40, %c0_i32_25 : i32
    scf.if %41 {
      %c0_26 = arith.constant 0 : index
      %c0_27 = arith.constant 0 : index
      %42 = vector.load %arg5[%c0_26, %c0_27] : memref<8x1xf32, #tpu.memory_space<vmem>>, vector<8x1xf32>
      %c0_28 = arith.constant 0 : index
      %c0_29 = arith.constant 0 : index
      %43 = vector.load %arg6[%c0_28, %c0_29] : memref<8x1xf32, #tpu.memory_space<vmem>>, vector<8x1xf32>
      %44 = math.log %43 : vector<8x1xf32>
      %45 = arith.addf %42, %44 : vector<8x1xf32>
      %cst_30 = arith.constant 3.200000e+01 : f32
      %46 = vector.broadcast %cst_30 : f32 to vector<8x1xf32>
      %47 = arith.mulf %46, %45 : vector<8x1xf32>
      %c0_31 = arith.constant 0 : index
      %c0_32 = arith.constant 0 : index
      %48 = vector.load %arg7[%c0_31, %c0_32] : memref<8x1xf32, #tpu.memory_space<vmem>>, vector<8x1xf32>
      %49 = arith.subf %47, %48 : vector<8x1xf32>
      %cst_33 = arith.constant 0.0032258064 : f32
      %50 = vector.broadcast %cst_33 : f32 to vector<8x1xf32>
      %51 = arith.mulf %50, %49 : vector<8x1xf32>
      %c0_34 = arith.constant 0 : index
      %c0_35 = arith.constant 0 : index
      %52 = vector.load %arg8[%c0_34, %c0_35] : memref<8x1xf32, #tpu.memory_space<vmem>>, vector<8x1xf32>
      %53 = arith.subf %45, %52 : vector<8x1xf32>
      %cst_36 = arith.constant 0.896774172 : f32
      %54 = vector.broadcast %cst_36 : f32 to vector<8x1xf32>
      %55 = arith.mulf %54, %53 : vector<8x1xf32>
      %56 = arith.addf %51, %55 : vector<8x1xf32>
      %c0_37 = arith.constant 0 : index
      %c0_38 = arith.constant 0 : index
      %57 = vector.load %arg4[%c0_37, %c0_38] : memref<8x1xf32, #tpu.memory_space<vmem>>, vector<8x1xf32>
      tpu.vector_store %arg4[%c0_37, %c0_38], %56 {strides = array<i32>} : memref<8x1xf32, #tpu.memory_space<vmem>>, vector<8x1xf32>,
    } else {
    }
    return
  }
  func.func @transform_0(%arg0: i32, %arg1: i32) -> (i32, i32) {
    %c0_i32 = arith.constant 0 : i32
    return %arg0, %arg1 : i32, i32
  }
  func.func @transform_1(%arg0: i32, %arg1: i32) -> (i32, i32) {
    %c0_i32 = arith.constant 0 : i32
    %c0_i32_0 = arith.constant 0 : i32
    return %arg0, %c0_i32 : i32, i32
  }
  func.func @transform_2(%arg0: i32, %arg1: i32) -> (i32, i32) {
    %c0_i32 = arith.constant 0 : i32
    %c0_i32_0 = arith.constant 0 : i32
    return %arg0, %c0_i32 : i32, i32
  }
}

</mosaic_0001>

<bundles_post_ra>
// kernel: tpu_custom_call.1
= control target key start
LH: loop header
LB: loop body
LE: loop exit
PB: predicated region body
PF: predicated region fallthrough
CT: control target
= control target key end

     0   :  { %vm32_vm0 = vcmask 261120   ;;  %vm15_vm1 = vcmask 7168   ;;  %v102_v1 = vmov -3.4028235e+38   ;;  %v103_v3 = vmov 0   ;;  %s142_s0 = inlined_call_operand.vmem [shape: f32[8,32], index: 0, kind: input, shape index: {}]   ;;  %s143_s1 = inlined_call_operand.vmem [shape: s32[8,1], index: 1, kind: input, shape index: {}]   ;;  %s144_s2 = inlined_call_operand.vmem [shape: f32[8,1], index: 2, kind: output, shape index: {}]  }
   0x1   :  { %v20_v0 = vld [vmem:[%s142_s0] sm:$0xff]  ;;  %16 = vst.msk [vmem:[#allocation2] sm:$0xff] %vm15_vm1, %v102_v1  ;;  %94 = vset.pattern.permute.xlu0 %v103_v3  ;;  %95 = vset.pattern.permute.xlu1 %v103_v3  ;;  %v104_v4 = vmov 0.0   ;;  %v25_v11 = vlaneseq }
   0x2   :  { %v33_v2 = vsel %vm32_vm0, %v20_v0, -inf  ;;  %17 = vst.msk [vmem:[#allocation3] sm:$0xff] %vm15_vm1, %v104_v4  ;;  %v21_v5 = vld [vmem:[%s143_s1] sm:$0xff]  ;;  %v58_v10 = vsel %vm32_vm0, %v20_v0, 0.0 }
   0x3   :  { %34 = vmax.xlane.f32.xlu0 %v33_v2  ;;  %18 = vst.msk [vmem:[#allocation4] sm:$0xff] %vm15_vm1, %v104_v4  ;;  %28 = vperm.xlu1 %95, %v21_v5   ;;  %v26_v13 = vand.u32 127, %v25_v11 }
   0x4   :  { %19 = vst.msk [vmem:[#allocation5] sm:$0xff] %vm15_vm1, %v104_v4  ;;  %59 = vadd.xlane.f32.xlu2 %v58_v10 }
   0x8   :  { %v31_v6 = vld [vmem:[#allocation2] sm:$0xff] }
   0x9   :  { %v40_v29 = vld [vmem:[#allocation3] sm:$0xff] }
   0xa   :  { %v57_v22 = vld [vmem:[#allocation4] sm:$0xff] }
   0xb   :  { %v63_v24 = vld [vmem:[#allocation5] sm:$0xff] }
  0x75   :  { %v29_v12 = vpop.permute.xlu1 %28 }
  0x76   :  { %v35_v7 = vpop.xlane.xlu0 %34  ;;  %vm30_vm2 = vcmp.eq.s32.totalorder %v26_v13, %v29_v12 }
  0x77   :  { %v36_v8 = vmax.f32 %v31_v6, %v35_v7  ;;  %v64_v14 = vsel %vm30_vm2, %v20_v0, 0.0  ;;  %v60_v21 = vpop.xlane.xlu2 %59 }
  0x78   :  { %v65_v15 = vsel %vm32_vm0, %v64_v14, 0.0  ;;  %v61_v23 = vadd.f32 %v60_v21, %v57_v22 }
  0x79   :  { %v37_v9 = vsub.f32 %v31_v6, %v36_v8  ;;  %56 = vst.msk [vmem:[#allocation2] sm:$0xff] %vm15_vm1, %v36_v8  ;;  %44 = vperm.xlu0 %94, %v36_v8   ;;  %66 = vadd.xlane.f32.xlu2 %v65_v15 }
  0x7a   :  { %62 = vst.msk [vmem:[#allocation4] sm:$0xff] %vm15_vm1, %v61_v23 }
  0x7b   :  { %v38_v27 = vmul.f32 1.442695, %v37_v9 }
  0x80   :  { %v73_v36 = vld [vmem:[#allocation2] sm:$0xff] }
  0x81   :  { %v79_v41 = vld [vmem:[#allocation4] sm:$0xff] }
  0xeb   :  { %v45_v16 = vpop.permute.xlu0 %44 }
  0xec   :  { %v47_v17 = vsub.f32 %v20_v0, %v45_v16  ;;  %v67_v25 = vpop.xlane.xlu2 %66 }
  0xed   :  { %v68_v26 = vadd.f32 %v67_v25, %v63_v24 }
  0xee   :  { %v48_v18 = vmul.f32 1.442695, %v47_v17 }
  0xef   :  { %69 = vst.msk [vmem:[#allocation5] sm:$0xff] %vm15_vm1, %v68_v26 }
  0xf0   :  { %96 = vpow2.f32 %v48_v18 }
  0xf1   :  { %98 = vpow2.f32 %v38_v27 }
  0xf6   :  { %v97_v19 = vpop.eup %96  ;;  %v82_v37 = vld [vmem:[#allocation5] sm:$0xff] }
  0xf7   :  { %v50_v20 = vsel %vm32_vm0, %v97_v19, 0.0  ;;  %v99_v28 = vpop.eup %98 }
  0xf8   :  { %51 = vadd.xlane.f32.xlu1 %v50_v20  ;;  %v41_v30 = vmul.f32 %v99_v28, %v40_v29 }
 0x16b   :  { %v52_v31 = vpop.xlane.xlu1 %51 }
 0x16c   :  { %v53_v32 = vadd.f32 %v52_v31, %v41_v30 }
 0x16e   :  { %55 = vst.msk [vmem:[#allocation3] sm:$0xff] %vm15_vm1, %v53_v32 }
 0x175   :  { %v74_v33 = vld [vmem:[#allocation3] sm:$0xff] }
 0x176   :  { %100 = vlog2.f32 %v74_v33 }
 0x17c   :  { %v101_v34 = vpop.eup %100 }
 0x17d   :  { %v76_v35 = vmul.f32 0.6931472, %v101_v34 }
 0x17f   :  { %v77_v38 = vadd.f32 %v76_v35, %v73_v36 }
 0x181   :  { %v78_v39 = vmul.f32 32.0, %v77_v38  ;;  %v83_v40 = vsub.f32 %v77_v38, %v82_v37 }
 0x183   :  { %v80_v42 = vsub.f32 %v78_v39, %v79_v41  ;;  %v84_v44 = vmul.f32 0.8967742, %v83_v40 }
 0x185   :  { %v81_v43 = vmul.f32 0.0032258064, %v80_v42 }
 0x187   :  { %v85_v45 = vadd.f32 %v84_v44, %v81_v43 }
 0x189   :  { %86 = vst.msk [vmem:[%s144_s2] sm:$0xff] %vm15_vm1, %v85_v45 }

</bundles_post_ra>
